<compile_context>
chip_gen: v6e
topology: v6e:2x2x1
jax: 0.10.0
libtpu: 0.0.40
codegen_flags: <defaults>
</compile_context>

<pallas_src>
import functools
import math

import jax
import jax.numpy as jnp
import numpy as np
from jax.experimental import pallas as pl
from jax.experimental.pallas import tpu as pltpu


# ---------------------------------------------------------------------------
# Host-side operator builders (match PyTorch AdaptiveAvgPool2d and
# F.interpolate(mode='bilinear', align_corners=False) semantics).
# ---------------------------------------------------------------------------
def adaptive_avg_pool_matrix(out_size, in_size):
    p = np.zeros((out_size, in_size), np.float32)
    for i in range(out_size):
        start = (i * in_size) // out_size
        end = -(-((i + 1) * in_size) // out_size)  # ceil div
        p[i, start:end] = 1.0 / (end - start)
    return p


def bilinear_upsample_matrix(out_size, in_size):
    u = np.zeros((out_size, in_size), np.float32)
    scale = in_size / out_size
    for d in range(out_size):
        src = (d + 0.5) * scale - 0.5
        src = max(src, 0.0)
        i0 = min(int(math.floor(src)), in_size - 1)
        frac = src - i0
        i1 = min(i0 + 1, in_size - 1)
        u[d, i0] += 1.0 - frac
        u[d, i1] += frac
    return u


# ---------------------------------------------------------------------------
# Fused Pallas kernel: pass-through + ALL pyramid bins + concat + ReLU.
# One grid step per batch element; x read once, output written once.
# ---------------------------------------------------------------------------
def ppm_fused_kernel(x_ref, w_ref, mb_ref, kp_ref, ku_ref, o_ref, *, c_in):
    """Per-block shapes (HW already lane-padded to a multiple of 128):

    x_ref : (1, C_in, HW)            input, spatial flattened onto lanes
    w_ref : (R, C_in)                stacked 1x1 conv weights, R = nb*C_out
    mb_ref: (2, R, S)                [0] block-diagonal 0/1 mask over S cols
                                     [1] bias * mask (bias folded in)
    kp_ref: (HW, S)                  concatenated kron(P_h, P_w)^T pool mats
    ku_ref: (S, HW)                  concatenated kron(U_h, U_w)^T upsample mats
    o_ref : (1, C_in + R, HW)        concat output (ReLU applied)
    """
    x = x_ref[0]                                            # (C_in, HW)

    # Pass-through branch of the concat (final ReLU applied here).
    o_ref[0, 0:c_in, :] = jnp.maximum(x, 0.0).astype(o_ref.dtype)

    # Adaptive average pooling for ALL bins: one lane-dense MXU matmul.
    pooled = jnp.dot(x, kp_ref[...], preferred_element_type=jnp.float32)   # (C_in, S)

    # ALL 1x1 convs fused into one MXU matmul over the stacked weights.
    y = jnp.dot(w_ref[...], pooled, preferred_element_type=jnp.float32)    # (R, S)

    # Block-diagonal mask (keep each bin's own pooled columns only) with the
    # conv bias folded in: y_masked = y*mask + bias*mask.  Cheap VPU work on a
    # tiny (R, S) tile; exactly reproduces PyTorch's conv(+bias) -> upsample.
    y = y * mb_ref[0] + mb_ref[1]

    # Bilinear upsample of every bin back to full resolution: one MXU matmul
    # with a lane-dense (R, HW) output, stored once (sublane-aligned offset).
    up = jnp.dot(y, ku_ref[...], preferred_element_type=jnp.float32)       # (R, HW)
    r = w_ref.shape[0]
    o_ref[0, c_in:c_in + r, :] = jnp.maximum(up, 0.0).astype(o_ref.dtype)


def ppm_fused_pallas(x_flat, w_all, mb_all, kp_all, ku_all, *, c_in):
    n, _, hw = x_flat.shape
    r, s_total = mb_all.shape[1], mb_all.shape[2]
    c_total = c_in + r
    itemsize = x_flat.dtype.itemsize

    # Explicit VMEM budget: double-buffered x/out blocks + (currently
    # double-buffered) grid-invariant operands + generous headroom, clamped to
    # v7x physical VMEM (64 MiB).
    resident = 2 * (c_in + c_total) * hw * itemsize
    resident += 2 * int(w_all.size + mb_all.size + kp_all.size + ku_all.size) * itemsize
    vmem_limit = int(min(resident + (32 << 20), 64 << 20))

    kernel = functools.partial(ppm_fused_kernel, c_in=c_in)
    return pl.pallas_call(
        kernel,
        out_shape=jax.ShapeDtypeStruct((n, c_total, hw), x_flat.dtype),
        grid=(n,),
        in_specs=[
            pl.BlockSpec((1, c_in, hw), lambda i: (i, 0, 0)),
            pl.BlockSpec((r, c_in), lambda i: (0, 0)),          # grid-invariant
            pl.BlockSpec((2, r, s_total), lambda i: (0, 0, 0)),  # grid-invariant
            pl.BlockSpec((hw, s_total), lambda i: (0, 0)),       # grid-invariant
            pl.BlockSpec((s_total, hw), lambda i: (0, 0)),       # grid-invariant
        ],
        out_specs=pl.BlockSpec((1, c_total, hw), lambda i: (i, 0, 0)),
        compiler_params=pltpu.CompilerParams(
            dimension_semantics=("parallel",),
            vmem_limit_bytes=vmem_limit),
    )(x_flat, w_all, mb_all, kp_all, ku_all)


# ---------------------------------------------------------------------------
# Full module forward (host-side glue: parameter stacking + operator build).
# ---------------------------------------------------------------------------
def pyramid_pooling_module(x, params, bins):
    n, c_in, h, w = x.shape
    c_out = params[0][0].shape[0]
    nb = len(bins)
    hw = h * w
    hw_pad = -(-hw // 128) * 128                  # lane-dense spatial extent

    # Stack per-bin 1x1-conv parameters once.
    w_all = jnp.concatenate([p[0] for p in params], axis=0)      # (nb*C_out, C_in)
    b_all = jnp.concatenate([p[1] for p in params], axis=0)      # (nb*C_out,)

    # Kronecker-factored pool / upsample operators, concatenated over bins.
    kp_blocks, ku_blocks, sizes = [], [], []
    for b in bins:
        ph = adaptive_avg_pool_matrix(b, h)       # (b, H)
        pw = adaptive_avg_pool_matrix(b, w)       # (b, W)
        uh = bilinear_upsample_matrix(h, b)       # (H, b)
        uw = bilinear_upsample_matrix(w, b)       # (W, b)
        kp_blocks.append(np.kron(ph, pw).T)       # (H*W, b*b)
        ku_blocks.append(np.kron(uh, uw).T)       # (b*b, H*W)
        sizes.append(b * b)
    kp_np = np.concatenate(kp_blocks, axis=1)     # (HW, S)
    ku_np = np.concatenate(ku_blocks, axis=0)     # (S, HW)
    s_total = kp_np.shape[1]

    # Block-diagonal mask over the S pooled columns (one block per bin) with
    # the conv bias baked in: mb_all[0] = mask, mb_all[1] = bias * mask.
    mask_np = np.zeros((nb * c_out, s_total), np.float32)
    off = 0
    for i, sz in enumerate(sizes):
        mask_np[i * c_out:(i + 1) * c_out, off:off + sz] = 1.0
        off += sz
    mask = jnp.asarray(mask_np)
    mb_all = jnp.stack([mask, mask * b_all[:, None]], axis=0)    # (2, R, S)

    # Zero-pad HW to a multiple of 128 (no-op here; keeps production shapes
    # like 60*60=3600 -> 3712 lane-dense with unmasked stores).
    x_flat = x.reshape(n, c_in, hw)
    if hw_pad != hw:
        x_flat = jnp.pad(x_flat, ((0, 0), (0, 0), (0, hw_pad - hw)))
        kp_np = np.pad(kp_np, ((0, hw_pad - hw), (0, 0)))
        ku_np = np.pad(ku_np, ((0, 0), (0, hw_pad - hw)))
    kp_all = jnp.asarray(kp_np)
    ku_all = jnp.asarray(ku_np)

    out_flat = ppm_fused_pallas(x_flat, w_all, mb_all, kp_all, ku_all, c_in=c_in)
    return out_flat[..., :hw].reshape(n, c_in + nb * c_out, h, w)


def pyramid_pooling_module_ref(x, params, bins):
    """Pure-jnp reference in the PyTorch order: pool -> conv(+bias) -> upsample."""
    n, c_in, h, w = x.shape
    pieces = [x]
    for b, (cw, cb) in zip(bins, params):
        ph = jnp.asarray(adaptive_avg_pool_matrix(b, h))
        pw = jnp.asarray(adaptive_avg_pool_matrix(b, w))
        uh = jnp.asarray(bilinear_upsample_matrix(h, b))
        uw = jnp.asarray(bilinear_upsample_matrix(w, b))
        pooled = jnp.einsum('ih,nchw,jw->ncij', ph, x, pw)
        conv = jnp.einsum('oc,ncij->noij', cw, pooled) + cb[None, :, None, None]
        up = jnp.einsum('Hi,noij,Wj->noHW', uh, conv, uw)
        pieces.append(up)
    return jnp.maximum(jnp.concatenate(pieces, axis=1), 0.0)


# ---------------------------------------------------------------------------
if __name__ == "__main__":
    # C_IN / C_OUT chosen as multiples of 8 so both channel-range stores into
    # the concatenated output are sublane-aligned (layout nicety, not a
    # correctness requirement).
    N, C_IN, C_OUT, H, W = 2, 8, 4, 16, 16
    BINS = (1, 2, 3, 6)

    key = jax.random.PRNGKey(0)
    kx, *kps = jax.random.split(key, 1 + 2 * len(BINS))
    x = jax.random.normal(kx, (N, C_IN, H, W), dtype=jnp.float32)

    # Deterministic 1x1 conv params per bin: weight (C_out, C_in), bias (C_out,)
    params = []
    for i in range(len(BINS)):
        wgt = jax.random.normal(kps[2 * i], (C_OUT, C_IN), dtype=jnp.float32) * 0.5
        bia = jax.random.normal(kps[2 * i + 1], (C_OUT,), dtype=jnp.float32) * 0.1
        params.append((wgt, bia))

    out = pyramid_pooling_module(x, params, BINS)
    out = jax.block_until_ready(out)

    ref = pyramid_pooling_module_ref(x, params, BINS)
    assert out.shape == (N, C_IN + C_OUT * len(BINS), H, W)
    np.testing.assert_allclose(np.asarray(out), np.asarray(ref),
                               rtol=1e-5, atol=1e-5)
    print("KERNEL_OK")
</pallas_src>

<mosaic_0001>
module attributes {stable_mosaic.version = 11 : i64} {
  func.func @ppm_fused_kernel(%arg0: i32, %arg1: memref<1x8x256xf32, #tpu.memory_space<vmem>>, %arg2: memref<16x8xf32, #tpu.memory_space<vmem>>, %arg3: memref<2x16x50xf32, #tpu.memory_space<vmem>>, %arg4: memref<256x50xf32, #tpu.memory_space<vmem>>, %arg5: memref<50x256xf32, #tpu.memory_space<vmem>>, %arg6: memref<1x24x256xf32, #tpu.memory_space<vmem>>) attributes {dimension_semantics = [#tpu.dimension_semantics<parallel>], iteration_bounds = array<i64: 2>, scalar_prefetch = 0 : i64, scratch_operands = 0 : i64, tpu.core_type = #tpu.core_type<tc>, window_params = [{transform_indices = @transform_0, window_bounds = array<i64: 1, 8, 256>}, {pipeline_mode = #tpu.pipeline_mode<synchronous>, transform_indices = @transform_1, window_bounds = array<i64: 16, 8>}, {pipeline_mode = #tpu.pipeline_mode<synchronous>, transform_indices = @transform_2, window_bounds = array<i64: 2, 16, 50>}, {pipeline_mode = #tpu.pipeline_mode<synchronous>, transform_indices = @transform_3, window_bounds = array<i64: 256, 50>}, {pipeline_mode = #tpu.pipeline_mode<synchronous>, transform_indices = @transform_4, window_bounds = array<i64: 50, 256>}, {transform_indices = @transform_5, window_bounds = array<i64: 1, 24, 256>}]} {
    %c0 = arith.constant 0 : index
    %c0_0 = arith.constant 0 : index
    %c0_1 = arith.constant 0 : index
    %0 = vector.load %arg1[%c0, %c0_0, %c0_1] : memref<1x8x256xf32, #tpu.memory_space<vmem>>, vector<1x8x256xf32>
    %1 = vector.shape_cast %0 : vector<1x8x256xf32> to vector<8x256xf32>
    %cst = arith.constant 0.000000e+00 : f32
    %2 = vector.broadcast %cst : f32 to vector<8x256xf32>
    %3 = arith.maximumf %1, %2 : vector<8x256xf32>
    %c0_2 = arith.constant 0 : index
    %c0_3 = arith.constant 0 : index
    %c0_4 = arith.constant 0 : index
    %4 = vector.load %arg6[%c0_2, %c0_3, %c0_4] : memref<1x24x256xf32, #tpu.memory_space<vmem>>, vector<1x8x256xf32>
    %5 = vector.shape_cast %4 : vector<1x8x256xf32> to vector<8x256xf32>
    %6 = vector.shape_cast %3 : vector<8x256xf32> to vector<1x8x256xf32>
    tpu.vector_store %arg6[%c0_2, %c0_3, %c0_4], %6 {strides = array<i32>} : memref<1x24x256xf32, #tpu.memory_space<vmem>>, vector<1x8x256xf32>,
    %c0_5 = arith.constant 0 : index
    %c0_6 = arith.constant 0 : index
    %7 = vector.load %arg4[%c0_5, %c0_6] : memref<256x50xf32, #tpu.memory_space<vmem>>, vector<256x50xf32>
    %cst_7 = arith.constant dense<0.000000e+00> : vector<8x50xf32>
    %8 = tpu.matmul %1, %7, %cst_7 {dimension_numbers = #tpu.dot_dimension_numbers<[1], [0], [0], [1], [0, 0, 1, 1], [], []>} : vector<8x256xf32>, vector<256x50xf32>, vector<8x50xf32> -> vector<8x50xf32>
    %c0_8 = arith.constant 0 : index
    %c0_9 = arith.constant 0 : index
    %9 = vector.load %arg2[%c0_8, %c0_9] : memref<16x8xf32, #tpu.memory_space<vmem>>, vector<16x8xf32>
    %cst_10 = arith.constant dense<0.000000e+00> : vector<16x50xf32>
    %10 = tpu.matmul %9, %8, %cst_10 {dimension_numbers = #tpu.dot_dimension_numbers<[1], [0], [0], [1], [0, 0, 1, 1], [], []>} : vector<16x8xf32>, vector<8x50xf32>, vector<16x50xf32> -> vector<16x50xf32>
    %c0_11 = arith.constant 0 : index
    %c0_12 = arith.constant 0 : index
    %c0_13 = arith.constant 0 : index
    %11 = vector.load %arg3[%c0_11, %c0_12, %c0_13] : memref<2x16x50xf32, #tpu.memory_space<vmem>>, vector<1x16x50xf32>
    %12 = vector.shape_cast %11 : vector<1x16x50xf32> to vector<16x50xf32>
    %13 = arith.mulf %10, %12 : vector<16x50xf32>
    %c1 = arith.constant 1 : index
    %c0_14 = arith.constant 0 : index
    %c0_15 = arith.constant 0 : index
    %14 = vector.load %arg3[%c1, %c0_14, %c0_15] : memref<2x16x50xf32, #tpu.memory_space<vmem>>, vector<1x16x50xf32>
    %15 = vector.shape_cast %14 : vector<1x16x50xf32> to vector<16x50xf32>
    %16 = arith.addf %13, %15 : vector<16x50xf32>
    %c0_16 = arith.constant 0 : index
    %c0_17 = arith.constant 0 : index
    %17 = vector.load %arg5[%c0_16, %c0_17] : memref<50x256xf32, #tpu.memory_space<vmem>>, vector<50x256xf32>
    %cst_18 = arith.constant dense<0.000000e+00> : vector<16x256xf32>
    %18 = tpu.matmul %16, %17, %cst_18 {dimension_numbers = #tpu.dot_dimension_numbers<[1], [0], [0], [1], [0, 0, 1, 1], [], []>} : vector<16x50xf32>, vector<50x256xf32>, vector<16x256xf32> -> vector<16x256xf32>
    %cst_19 = arith.constant 0.000000e+00 : f32
    %19 = vector.broadcast %cst_19 : f32 to vector<16x256xf32>
    %20 = arith.maximumf %18, %19 : vector<16x256xf32>
    %c0_20 = arith.constant 0 : index
    %c8 = arith.constant 8 : index
    %c0_21 = arith.constant 0 : index
    %21 = vector.load %arg6[%c0_20, %c8, %c0_21] : memref<1x24x256xf32, #tpu.memory_space<vmem>>, vector<1x16x256xf32>
    %22 = vector.shape_cast %21 : vector<1x16x256xf32> to vector<16x256xf32>
    %23 = vector.shape_cast %20 : vector<16x256xf32> to vector<1x16x256xf32>
    tpu.vector_store %arg6[%c0_20, %c8, %c0_21], %23 {strides = array<i32>} : memref<1x24x256xf32, #tpu.memory_space<vmem>>, vector<1x16x256xf32>,
    return
  }
  func.func @transform_0(%arg0: i32) -> (i32, i32, i32) {
    %c0_i32 = arith.constant 0 : i32
    %c0_i32_0 = arith.constant 0 : i32
    %c0_i32_1 = arith.constant 0 : i32
    return %arg0, %c0_i32, %c0_i32_0 : i32, i32, i32
  }
  func.func @transform_1(%arg0: i32) -> (i32, i32) {
    %c0_i32 = arith.constant 0 : i32
    %c0_i32_0 = arith.constant 0 : i32
    %c0_i32_1 = arith.constant 0 : i32
    return %c0_i32, %c0_i32_0 : i32, i32
  }
  func.func @transform_2(%arg0: i32) -> (i32, i32, i32) {
    %c0_i32 = arith.constant 0 : i32
    %c0_i32_0 = arith.constant 0 : i32
    %c0_i32_1 = arith.constant 0 : i32
    %c0_i32_2 = arith.constant 0 : i32
    return %c0_i32, %c0_i32_0, %c0_i32_1 : i32, i32, i32
  }
  func.func @transform_3(%arg0: i32) -> (i32, i32) {
    %c0_i32 = arith.constant 0 : i32
    %c0_i32_0 = arith.constant 0 : i32
    %c0_i32_1 = arith.constant 0 : i32
    return %c0_i32, %c0_i32_0 : i32, i32
  }
  func.func @transform_4(%arg0: i32) -> (i32, i32) {
    %c0_i32 = arith.constant 0 : i32
    %c0_i32_0 = arith.constant 0 : i32
    %c0_i32_1 = arith.constant 0 : i32
    return %c0_i32, %c0_i32_0 : i32, i32
  }
  func.func @transform_5(%arg0: i32) -> (i32, i32, i32) {
    %c0_i32 = arith.constant 0 : i32
    %c0_i32_0 = arith.constant 0 : i32
    %c0_i32_1 = arith.constant 0 : i32
    return %arg0, %c0_i32, %c0_i32_0 : i32, i32, i32
  }
}

</mosaic_0001>

<bundles_post_ra>
// kernel: tpu_custom_call.1
= control target key start
LH: loop header
LB: loop body
LE: loop exit
PB: predicated region body
PF: predicated region fallthrough
CT: control target
= control target key end

     0   :  { %10 = vsyncpa [#allocation3], 0  ;;  %s1085_s0 = inlined_call_operand.vmem [shape: f32[2,8,256], index: 0, kind: input, shape index: {}]   ;;  %s1086_s1 = inlined_call_operand.vmem [shape: f32[16,8], index: 1, kind: input, shape index: {}]   ;;  %s1087_s2 = inlined_call_operand.vmem [shape: f32[2,16,50], index: 2, kind: input, shape index: {}]   ;;  %s1088_s3 = inlined_call_operand.vmem [shape: f32[256,50], index: 3, kind: input, shape index: {}]   ;;  %s1089_s4 = inlined_call_operand.vmem [shape: f32[50,256], index: 4, kind: input, shape index: {}]   ;;  %s1090_s5 = inlined_call_operand.hbm [shape: f32[2,24,256], index: 5, kind: output, shape index: {}]  }
   0x1   :  { %12 = vsyncpa [#allocation3 + $0x1], 0  ;;  %s814_s18 = smov 0   ;;  %s816_s19 = smov 0  }
   0x2   :  { %s818_s20 = smov 0   ;;  %s820_s21 = smov 0  }
   0x3 LB: > { %s835_s22 = sadd.s32 4294967295, %s778_s21   ;;  %s613_s23 = sadd.s32 4294967294, %s778_s21   ;;  %s778_s21 = sphi %s820_s21, %s1096_s21   ;;  %s774_s20 = sphi %s818_s20, %s1095_s20   ;;  %s770_s19 = sphi %s816_s19, %s1094_s19   ;;  %s766_s18 = sphi %s814_s18, %s1093_s18  }
   0x4   : > { %s839_s24 = sadd.s32 1, %s778_s21   ;;  %s135_s25 = sadd.s32 1, %s774_s20 }
   0x5   : > { %s132_s26 = ssub.s32 %s778_s21, %s839_s24  ;;  %p145_p0 = scmp.ne.s32.totalorder %s774_s20, %s770_s19 }
   0x6   : > { %p133_p1 = scmp.eq.s32.totalorder %s132_s26, 0  ;;  %p146_p2 = scmp.eq.s32.totalorder %s835_s22, 1 }
   0x7   : > { %p151_p3 = scmp.ne.s32.totalorder %s770_s19, %s766_s18  ;;  %p152_p4 = scmp.eq.s32.totalorder %s613_s23, 1 }
   0x8   : > { %s850_s27 = scalar_select %p133_p1, %s774_s20, %s135_s25  }
   0x9   : > { %p852_p5 = por %p146_p2, %p145_p0  ;;  %p856_p6 = por %p152_p4, %p151_p3 }
   0xa   : > { %p616_p7 = scmp.ge.s32.totalorder %s778_s21, 1  ;;  %p190_p8 = scmp.lt.s32.totalorder %s778_s21, 3 }
   0xc   : > { %p191_p9 = pnand %p616_p7, %p190_p8 }
   0xd   : > { %p218_p10 = scmp.lt.s32.totalorder (!%p191_p9), %s835_s22, 1  ;;  %s215_s7 = sand.u32 (!%p191_p9), 1, %s770_s19  }
   0xe   : > { %194 = sbr.rel (%p191_p9) target bundleno = 665 (0x299), region = 40 }
   0xf   : > { %s674_s17 = smul.u32 (!%p191_p9), 48, %s215_s7 }
  0x11   : > { %s918_s13 = scalar_lea.vmem (!%p191_p9), [#allocation2], %s674_s17 }
  0x12   : > { %s551_s23 = sshll.u32 (!%p191_p9), %s918_s13, 4  ;;  %s1034_s23 = int_to_ptr.vmem [resolvable:$true] %s551_s23 }
  0x13   : > { %v260_v0 = vld [vmem:[%s1088_s3 + $0xf8] sm:$0xff]  ;;  %v259_v2 = vld [vmem:[%s1088_s3 + $0xf0] sm:$0xff]  ;;  %v258_v4 = vld [vmem:[%s1088_s3 + $0xe8] sm:$0xff]  ;;  %s219_s15 = scalar_select %p218_p10, %s835_s22, 1  ;;  %vm333_vm0 = vcmask 64512   ;;  %vm445_vm1 = vcmask 1041408  }
  0x14   : > { %v244_v1 = vld [vmem:[%s1088_s3 + $0x78] sm:$0xff]  ;;  %631 = vmatprep.subr.mxu0 %v260_v0  ;;  %v243_v3 = vld [vmem:[%s1088_s3 + $0x70] sm:$0xff]  ;;  %v242_v5 = vld [vmem:[%s1088_s3 + $0x68] sm:$0xff]  ;;  %v780_v55 = vmov 0.0   ;;  %vm438_vm2 = vcmask 408576   ;;  %s718_s6 = scalar_lea.vmem %s1034_s23, 768 }
  0x15   : > { %632 = vmatpush3.msra.mxu0 %v244_v1  ;;  %v257_v6 = vld [vmem:[%s1088_s3 + $0xe0] sm:$0xff]  ;;  %s630_s26 = sshll.u32 %s219_s15, 4  ;;  %v256_v8 = vld [vmem:[%s1088_s3 + $0xd8] sm:$0xff]  ;;  %v255_v10 = vld [vmem:[%s1088_s3 + $0xd0] sm:$0xff]  ;;  %p719_p11 = scmp.ne.s32.totalorder %s1034_s23, %s718_s6 }
  0x16   : > { %633 = vmatprep.subr.mxu0 %v259_v2  ;;  %v241_v7 = vld [vmem:[%s1088_s3 + $0x60] sm:$0xff]  ;;  %v240_v9 = vld [vmem:[%s1088_s3 + $0x58] sm:$0xff]  ;;  %s222_s14 = scalar_lea.vmem %s1085_s0, %s630_s26  ;;  %v239_v11 = vld [vmem:[%s1088_s3 + $0x50] sm:$0xff]  ;;  %s781_s26 = smov [#allocation2]  }
  0x17   : > { %634 = vmatpush3.msra.mxu0 %v243_v3  ;;  %v254_v12 = vld [vmem:[%s1088_s3 + $0xc8] sm:$0xff]  ;;  %v223_v16 = vld [vmem:[%s222_s14] sm:$0xff]  ;;  %v252_v20 = vld [vmem:[%s1088_s3 + $0xb8] sm:$0xff]  ;;  %p720_p12 = pnand %p719_p11, %p852_p5  ;;  %s722_s8 = sshll.u32 %s781_s26, 4  ;;  %s723_s8 = int_to_ptr.vmem [resolvable:$false] %s722_s8 }
  0x18   : > { %635 = vmatprep.subr.mxu0 %v258_v4  ;;  %v224_v13 = vld [vmem:[%s222_s14 + $0x8] sm:$0xff]  ;;  %v253_v17 = vld [vmem:[%s1088_s3 + $0xc0] sm:$0xff]  ;;  %v225_v18 = vmax.f32 %v223_v16, 0.0  ;;  %v236_v21 = vld [vmem:[%s1088_s3 + $0x38] sm:$0xff]  ;;  %s675_s14 = smul.u32 768, %s835_s22  ;;  %s1045_s22 = scalar_lea.sflag [#allocation3], %s215_s7 }
  0x19   : > { %636 = vmatpush3.msra.mxu0 %v242_v5  ;;  %v238_v14 = vld [vmem:[%s1088_s3 + $0x48] sm:$0xff]  ;;  %v226_v15 = vmax.f32 %v224_v13, 0.0  ;;  %325 = vmatprep.mubr.f32.mxu0 %v224_v13  ;;  %v237_v19 = vld [vmem:[%s1088_s3 + $0x40] sm:$0xff]  ;;  %v251_v22 = vld [vmem:[%s1088_s3 + $0xb0] sm:$0xff]  ;;  %p721_p13 = pneg %p720_p12  ;;  %s724_s9 = scalar_lea.vmem %s723_s8, 1536 }
  0x1a   : > { %637 = vmatprep.subr.mxu0 %v257_v6  ;;  %227 = vst [vmem:[%s918_s13] sm:$0xff] %v225_v18  ;;  %v235_v23 = vld [vmem:[%s1088_s3 + $0x30] sm:$0xff]  ;;  %v250_v24 = vld [vmem:[%s1088_s3 + $0xa8] sm:$0xff]  ;;  %v249_v26 = vld [vmem:[%s1088_s3 + $0xa0] sm:$0xff]  ;;  %s1039_s17 = scalar_lea.hbm %s1090_s5, %s675_s14  ;;  %p725_p0 = scmp.lt.s32.totalorder %s1034_s23, %s723_s8 }
  0x1b   : > { %638 = vmatpush3.msra.mxu0 %v241_v7  ;;  %228 = vst [vmem:[%s918_s13 + $0x8] sm:$0xff] %v226_v15  ;;  %v234_v25 = vld [vmem:[%s1088_s3 + $0x28] sm:$0xff]  ;;  %v233_v27 = vld [vmem:[%s1088_s3 + $0x20] sm:$0xff]  ;;  %v248_v28 = vld [vmem:[%s1088_s3 + $0x98] sm:$0xff]  ;;  %p726_p1 = scmp.lt.s32.totalorder %s724_s9, %s718_s6 }
  0x1c   : > { %639 = vmatprep.subr.mxu0 %v256_v8  ;;  %v232_v29 = vld [vmem:[%s1088_s3 + $0x18] sm:$0xff]  ;;  %v247_v30 = vld [vmem:[%s1088_s3 + $0x90] sm:$0xff]  ;;  %v246_v32 = vld [vmem:[%s1088_s3 + $0x88] sm:$0xff] }
  0x1d   : > { %640 = vmatpush3.msra.mxu0 %v240_v9  ;;  %v231_v31 = vld [vmem:[%s1088_s3 + $0x10] sm:$0xff]  ;;  %v230_v33 = vld [vmem:[%s1088_s3 + $0x8] sm:$0xff]  ;;  %v245_v34 = vld [vmem:[%s1088_s3 + $0x80] sm:$0xff]  ;;  %p727_p2 = por %p726_p1, %p725_p0 }
  0x1e   : > { %641 = vmatprep.subr.mxu0 %v255_v10  ;;  %v229_v35 = vld [vmem:[%s1088_s3] sm:$0xff]  ;;  %v332_v40 = vld [vmem:[%s1086_s1 + $0x8] sm:$0xff]  ;;  %v435_v43 = vld [vmem:[%s1089_s4 + $0x58] sm:$0xff] }
  0x1f   : > { %642 = vmatpush3.msra.mxu0 %v239_v11  ;;  %v331_v36 = vld [vmem:[%s1086_s1] sm:$0xff]  ;;  %v437_v41 = vld [vmem:[%s1089_s4 + $0x68] sm:$0x3]  ;;  %v434_v44 = vld [vmem:[%s1089_s4 + $0x50] sm:$0xff]  ;;  %p728_p3 = pnand %p727_p2, %p721_p13 }
  0x20   : > { %643 = vmatprep.subr.mxu0 %v254_v12  ;;  %671 = vmatprep.mubr.msk.f32.mxu1 %vm333_vm0, %v331_v36  ;;  %v436_v42 = vld [vmem:[%s1089_s4 + $0x60] sm:$0x3]  ;;  %v433_v45 = vld [vmem:[%s1089_s4 + $0x48] sm:$0xff]  ;;  %v431_v47 = vld [vmem:[%s1089_s4 + $0x38] sm:$0xff] }
  0x21   : > { %644 = vmatpush3.msra.mxu0 %v238_v14  ;;  %v432_v46 = vld [vmem:[%s1089_s4 + $0x40] sm:$0xff]  ;;  %v430_v48 = vld [vmem:[%s1089_s4 + $0x30] sm:$0xff]  ;;  %v429_v49 = vld [vmem:[%s1089_s4 + $0x28] sm:$0xff] }
  0x22   : > { %645 = vmatprep.subr.mxu0 %v253_v17  ;;  %v428_v50 = vld [vmem:[%s1089_s4 + $0x20] sm:$0xff]  ;;  %v427_v51 = vld [vmem:[%s1089_s4 + $0x18] sm:$0xff]  ;;  %v426_v52 = vld [vmem:[%s1089_s4 + $0x10] sm:$0xff] }
  0x23   : > { %646 = vmatpush3.msra.mxu0 %v237_v19  ;;  %v425_v53 = vld [vmem:[%s1089_s4 + $0x8] sm:$0xff]  ;;  %v424_v54 = vld [vmem:[%s1089_s4] sm:$0xff]  ;;  %v621_v60 = vld [vmem:[%s1087_s2 + $0x10] sm:$0xff] }
  0x24   : > { %647 = vmatprep.subr.mxu0 %v252_v20  ;;  %v415_v57 = vld [vmem:[%s1087_s2] sm:$0xff]  ;;  %v416_v58 = vld [vmem:[%s1087_s2 + $0x8] sm:$0xff]  ;;  %v622_v0 = vld [vmem:[%s1087_s2 + $0x18] sm:$0xff] }
  0x25   : > { %648 = vmatpush3.msra.mxu0 %v236_v21 }
  0x26   : > { %649 = vmatprep.subr.mxu0 %v251_v22 }
  0x27   : > { %650 = vmatpush3.msra.mxu0 %v235_v23 }
  0x28   : > { %651 = vmatprep.subr.mxu0 %v250_v24 }
  0x29   : > { %652 = vmatpush3.msra.mxu0 %v234_v25 }
  0x2a   : > { %653 = vmatprep.subr.mxu0 %v249_v26 }
  0x2b   : > { %654 = vmatpush3.msra.mxu0 %v233_v27 }
  0x2c   : > { %655 = vmatprep.subr.mxu0 %v248_v28 }
  0x2d   : > { %656 = vmatpush3.msra.mxu0 %v232_v29 }
  0x2e   : > { %657 = vmatprep.subr.mxu0 %v247_v30 }
  0x2f   : > { %658 = vmatpush3.msra.mxu0 %v231_v31 }
  0x30   : > { %659 = vmatprep.subr.mxu0 %v246_v32 }
  0x31   : > { %660 = vmatpush3.msra.mxu0 %v230_v33 }
  0x32   : > { %661 = vmatprep.subr.mxu0 %v245_v34 }
  0x33   : > { %662 = vmatpush3.msra.mxu0 %v229_v35 }
  0x34   : > { %326 = vmatmul.mubr.f32.vlgmr.msra.gmra.mxu0 %v223_v16 }
  0xf4   : > { %v663_v37 = vpop.f32.mrf.mxu0 }
  0xf6   : > { %v664_v38 = vpop.f32.mrf.mxu0 }
  0xf7   : > { %v665_v39 = vadd.f32 %v664_v38, %v663_v37 }
  0xf9   : > { %669 = vmatprep.subr.mxu1 %v665_v39 }
  0xfa   : > { %670 = vmatpush3.msra.mxu1 %v665_v39 }
  0xfb   : > { %672 = vmatmul.mubr.msk.f32.vlgmr.msra.gmra.mxu1 %vm333_vm0, %v332_v40  ;;  %623 = vmatprep.subr.msk.mxu1 %vm445_vm1, %v437_v41 }
  0xfc   : > { %624 = vmatpush1.msk.msra.mxu1 %vm445_vm1, %v436_v42  ;;  %516 = vmatprep.mubr.f32.mxu1 %v780_v55 }
  0xfd   : > { %472 = vmatprep.subr.mxu1 %v435_v43 }
  0xfe   : > { %473 = vmatpush1.msra.mxu1 %v434_v44 }
  0xff   : > { %474 = vmatprep.subr.mxu1 %v433_v45 }
 0x100   : > { %475 = vmatpush1.msra.mxu1 %v432_v46 }
 0x101   : > { %476 = vmatprep.subr.mxu1 %v431_v47 }
 0x102   : > { %477 = vmatpush1.msra.mxu1 %v430_v48 }
 0x103   : > { %478 = vmatprep.subr.mxu1 %v429_v49 }
 0x104   : > { %479 = vmatpush1.msra.mxu1 %v428_v50 }
 0x105   : > { %480 = vmatprep.subr.mxu1 %v427_v51 }
 0x106   : > { %481 = vmatpush1.msra.mxu1 %v426_v52 }
 0x107   : > { %482 = vmatprep.subr.mxu1 %v425_v53 }
 0x108   : > { %483 = vmatpush1.msra.mxu1 %v424_v54 }
 0x1bb   : > { %v673_v56 = vpop.f32.mrf.mxu1 }
 0x1bc   : > { %v418_v62 = vmul.f32 %v673_v56, %v416_v58 }
 0x1bd   : > { %v406_v59 = vpop.f32.mrf.mxu1 }
 0x1be   : > { %v417_v61 = vmul.f32 %v415_v57, %v406_v59  ;;  %v423_v1 = vadd.f32 %v622_v0, %v418_v62 }
 0x1c0   : > { %v422_v63 = vadd.f32 %v621_v60, %v417_v61 }
 0x1c2   : > { %625 = vmatmul.mubr.msk.f32.vlgmr.msra.gmra.mxu1 %vm438_vm2, %v422_v63 }
 0x1c3   : > { %522 = vmatprep.mubr.f32.mxu1 %v780_v55 }
 0x1c6   : > { %626 = vmatmul.mubr.msk.f32.gmra.mxu1 %vm438_vm2, %v423_v1 }
 0x282   : > { %v518_v2 = vpop.f32.mrf.mxu1 }
 0x283   : > { %v529_v3 = vmax.f32 %v518_v2, 0.0 }
 0x284   : > { %v520_v4 = vpop.f32.mrf.mxu1 }
 0x285   : > { %533 = vst [vmem:[%s918_s13 + $0x10] sm:$0xff] %v529_v3  ;;  %v530_v5 = vmax.f32 %v520_v4, 0.0 }
 0x286   : > { %v524_v6 = vpop.f32.mrf.mxu1 }
 0x287   : > { %534 = vst [vmem:[%s918_s13 + $0x18] sm:$0xff] %v530_v5  ;;  %v531_v7 = vmax.f32 %v524_v6, 0.0 }
 0x288   : > { %v526_v8 = vpop.f32.mrf.mxu1 }
 0x289   : > { %535 = vst [vmem:[%s918_s13 + $0x20] sm:$0xff] %v531_v7  ;;  %v532_v9 = vmax.f32 %v526_v8, 0.0 }
 0x28b   : > { %536 = vst [vmem:[%s918_s13 + $0x28] sm:$0xff] %v532_v9 }
 0x28c   : > { %731 = shalt.err (!%p728_p3)
}
 0x28d   : > { %s732_s7 = scalar_lea.hbm %s1039_s17, 768  ;;  %s736_s11 = scalar_lea.hbm %s1090_s5, 1536 }
 0x28e   : > { %p733_p4 = scmp.ne.s32.totalorder %s1039_s17, %s732_s7  ;;  %p737_p9 = scmp.lt.s32.totalorder %s1039_s17, %s1090_s5 }
 0x28f   : > { %p738_p10 = scmp.lt.s32.totalorder %s736_s11, %s732_s7 }
 0x290   : > { %p734_p7 = pnand %p733_p4, %p852_p5 }
 0x291   : > { %p739_p11 = por %p738_p10, %p737_p9 }
 0x292   : > { %p735_p8 = pneg %p734_p7 }
 0x294   : > { %p740_p12 = pnand %p739_p11, %p735_p8 }
 0x296   : > { %743 = shalt.err (!%p740_p12)
}
 0x297   : > { %s782_s16 = smov 256   ;;  %s783_s14 = smov 16  }
 0x298   : > { %676 = dma.vmem_to_hbm [thread:$0]  (%p852_p5), %s1034_s23, 768, %s1039_s17, %s1045_s22, %s782_s16, %s782_s16, %s783_s14  }
 0x299 PF: > { %p682_p13 = scmp.ge.s32.totalorder %s778_s21, 2  ;;  %s566_s25 = sand.u32 1, %s766_s18  }
 0x29a   : > { %s567_s30 = scalar_lea.sflag [#allocation3], %s566_s25 }
 0x29b   : > { %p679_p0 = pnand %p682_p13, %p856_p6 }
 0x29d   : > { %p680_p1 = pneg %p679_p0 }
 0x29f   : > { %761 = dma.done.wait (%p680_p1), %s567_s30, 768  }
 0x2a0   : > { %763 = vsyncadd (%p680_p1), %s567_s30, 4294966528  ;;  %p15_p2 = scmp.ge.s32.totalorder %s839_s24, 4   ;;  %s1093_s18 = smov %s770_s19 }
 0x2a1   : > { %s1094_s19 = smov %s774_s20  ;;  %s1095_s20 = smov %s850_s27 }
 0x2a2   : > { %s1096_s21 = smov %s839_s24  ;;  %17 = sbr.rel (!%p15_p2) target bundleno = 3 (0x3), region = 76 }
 0x2a7   :  { %572 = vsyncpa [#allocation3], 1 }
 0x2a8   :  { %574 = vsyncpa [#allocation3 + $0x1], 1 }

</bundles_post_ra>
